<compile_context>
chip_gen: v6e
topology: v6e:2x2x1
jax: 0.10.0
libtpu: 0.0.40
codegen_flags: <defaults>
</compile_context>

<pallas_src>
import math

import jax
import jax.numpy as jnp
from jax.experimental import pallas as pl
from jax.experimental.pallas import tpu as pltpu


def _make_kernel(*, num_heads, d_k, block_b, S, D, with_mask, fused_qkv,
                 compute_dtype):
    H = num_heads
    scale = 1.0 / math.sqrt(d_k)
    BtS = block_b * S

    def attention(q, k, v, mask_ref):
        # q/k/v: (block_b*S, D) float32; q already scaled by 1/sqrt(d_k).
        rows = []
        for b in range(block_b):                                   # static loop
            qs = q[b * S:(b + 1) * S].astype(compute_dtype)
            ks = k[b * S:(b + 1) * S].astype(compute_dtype)
            vs = v[b * S:(b + 1) * S].astype(compute_dtype)
            # Head-batched (H, S, d_k) layout: one batched MXU einsum per step
            # instead of per-head matmuls + masked d_k-wide scratch stores.
            qh = jnp.stack([qs[:, h * d_k:(h + 1) * d_k] for h in range(H)], axis=0)
            kh = jnp.stack([ks[:, h * d_k:(h + 1) * d_k] for h in range(H)], axis=0)
            vh = jnp.stack([vs[:, h * d_k:(h + 1) * d_k] for h in range(H)], axis=0)

            s = jnp.einsum("hqd,hkd->hqk", qh, kh,
                           preferred_element_type=jnp.float32)      # (H,S,S) f32
            if with_mask:
                s = s + mask_ref[b][None, :, :]      # additive mask, pre-scaled
            s = s - jnp.max(s, axis=-1, keepdims=True)
            e = jnp.exp(s)                                           # f32 (EUP)
            p = e * pl.reciprocal(jnp.sum(e, axis=-1, keepdims=True),
                                  approx=True)
            ctx = jnp.einsum("hqk,hkd->hqd", p.astype(compute_dtype), vh,
                             preferred_element_type=jnp.float32)     # (H,S,d_k)
            # Re-assemble head-major (S, D) context as a value -> single
            # lane-dense store path; no VMEM scratch roundtrip.
            rows.append(jnp.concatenate([ctx[h] for h in range(H)], axis=1))
        return rows[0] if block_b == 1 else jnp.concatenate(rows, axis=0)

    def kernel(*refs):
        out_ref = refs[-1]
        i = 0
        if fused_qkv:
            x_ref = refs[i]; i += 1
        else:
            xq_ref, xk_ref, xv_ref = refs[i:i + 3]; i += 3
        mask_ref = None
        if with_mask:
            mask_ref = refs[i]; i += 1
        if fused_qkv:
            wqkv_ref, bqkv_ref = refs[i:i + 2]; i += 2
        else:
            wq_ref, bq_ref, wk_ref, bk_ref, wv_ref, bv_ref = refs[i:i + 6]; i += 6
        wo_ref, bo_ref = refs[i:i + 2]

        if fused_qkv:
            # Self-attention fast path: one (BtS, D) @ (D, 3D) matmul.
            x = x_ref[...].reshape(BtS, D)
            qkv = (jnp.dot(x, wqkv_ref[...],
                           preferred_element_type=jnp.float32) + bqkv_ref[...])
            q = qkv[:, 0 * D:1 * D] * scale
            k = qkv[:, 1 * D:2 * D]
            v = qkv[:, 2 * D:3 * D]
        else:
            xq = xq_ref[...].reshape(BtS, D)
            xk = xk_ref[...].reshape(BtS, D)
            xv = xv_ref[...].reshape(BtS, D)
            q = (jnp.dot(xq, wq_ref[...], preferred_element_type=jnp.float32)
                 + bq_ref[...]) * scale
            k = (jnp.dot(xk, wk_ref[...], preferred_element_type=jnp.float32)
                 + bk_ref[...])
            v = (jnp.dot(xv, wv_ref[...], preferred_element_type=jnp.float32)
                 + bv_ref[...])

        ctx = attention(q, k, v, mask_ref)                  # (block_b*S, D) f32
        out = (jnp.dot(ctx.astype(compute_dtype), wo_ref[...],
                       preferred_element_type=jnp.float32) + bo_ref[...])
        # Dropout is identity in eval mode.
        out_ref[...] = out.reshape(block_b, S, D).astype(out_ref.dtype)

    return kernel


def _vmem_limit_bytes(*, block_b, S, D, n_x_inputs, with_mask, compute_itemsize):
    """Rough per-step VMEM footprint -> explicit limit for large configs."""
    MiB = 1024 * 1024
    x_blk = n_x_inputs * block_b * S * D * compute_itemsize
    w_blk = 4 * D * D * compute_itemsize + 4 * D * 4          # weights + biases
    m_blk = block_b * S * S * 4 if with_mask else 0
    o_blk = block_b * S * D * 4
    pipelined = 2 * (x_blk + w_blk + m_blk + o_blk)           # double-buffered
    temps = block_b * S * (3 * D) * 4 + 2 * block_b * S * S * 4
    est = pipelined + temps + 2 * MiB
    if est <= 32 * MiB:
        return None                     # default scoped limit is fine (all gens)
    return int(min(est, 60 * MiB))      # stay under v7x's 64 MiB physical VMEM


def multi_headed_attention(query, key, value, params, *, num_heads, mask=None,
                           block_b=1, compute_dtype=jnp.bfloat16):
    """Pallas implementation of MultiHeadedAttention.forward (eval mode)."""
    B, S, D = query.shape
    assert D % num_heads == 0
    assert B % block_b == 0
    d_k = D // num_heads
    nblk = B // block_b
    f32 = jnp.float32

    wq, bq, wk, bk, wv, bv, wo, bo = params
    fused = (key is query) and (value is query)     # self-attention fast path
    with_mask = mask is not None

    kernel = _make_kernel(num_heads=num_heads, d_k=d_k, block_b=block_b, S=S,
                          D=D, with_mask=with_mask, fused_qkv=fused,
                          compute_dtype=compute_dtype)

    x_spec = pl.BlockSpec((block_b, S, D), lambda i: (i, 0, 0))
    m_spec = pl.BlockSpec((block_b, S, S), lambda i: (i, 0, 0))
    w_spec = pl.BlockSpec((D, D), lambda i: (0, 0))
    w3_spec = pl.BlockSpec((D, 3 * D), lambda i: (0, 0))
    b_spec = pl.BlockSpec((1, D), lambda i: (0, 0))
    b3_spec = pl.BlockSpec((1, 3 * D), lambda i: (0, 0))
    # NOTE: weights are grid-invariant (constant index_map) so they are only
    # DMA'd once across the whole grid.

    args, specs = [], []
    if fused:
        args.append(query.astype(compute_dtype)); specs.append(x_spec)
    else:
        args += [query.astype(compute_dtype), key.astype(compute_dtype),
                 value.astype(compute_dtype)]
        specs += [x_spec, x_spec, x_spec]
    if with_mask:
        # Module semantics: scores += mask * -1e9 (mask==1 positions suppressed).
        mask_bias = jnp.broadcast_to(mask, (B, S, S)).astype(f32) * (-1.0e9)
        args.append(mask_bias); specs.append(m_spec)
    if fused:
        wqkv_t = jnp.concatenate([wq.T, wk.T, wv.T], axis=1).astype(compute_dtype)
        bqkv = jnp.concatenate([bq, bk, bv]).reshape(1, 3 * D).astype(f32)
        args += [wqkv_t, bqkv]; specs += [w3_spec, b3_spec]
    else:
        args += [wq.T.astype(compute_dtype), bq.reshape(1, D).astype(f32),
                 wk.T.astype(compute_dtype), bk.reshape(1, D).astype(f32),
                 wv.T.astype(compute_dtype), bv.reshape(1, D).astype(f32)]
        specs += [w_spec, b_spec, w_spec, b_spec, w_spec, b_spec]
    args += [wo.T.astype(compute_dtype), bo.reshape(1, D).astype(f32)]
    specs += [w_spec, b_spec]

    vmem_limit = _vmem_limit_bytes(
        block_b=block_b, S=S, D=D, n_x_inputs=(1 if fused else 3),
        with_mask=with_mask, compute_itemsize=jnp.dtype(compute_dtype).itemsize)

    out = pl.pallas_call(
        kernel,
        out_shape=jax.ShapeDtypeStruct((B, S, D), jnp.float32),
        grid=(nblk,),
        in_specs=specs,
        out_specs=pl.BlockSpec((block_b, S, D), lambda i: (i, 0, 0)),
        compiler_params=pltpu.CompilerParams(
            dimension_semantics=("parallel",),
            vmem_limit_bytes=vmem_limit),
    )(*args)
    return out


def _reference(query, key, value, params, *, num_heads, mask=None):
    """Pure-JAX f32 reference mirroring the PyTorch module (eval mode)."""
    B, S, D = query.shape
    d_k = D // num_heads
    wq, bq, wk, bk, wv, bv, wo, bo = params

    def lin(x, w, b):
        return x @ w.T + b

    def split(x):  # (B,S,D) -> (B,H,S,d_k)
        return x.reshape(B, S, num_heads, d_k).transpose(0, 2, 1, 3)

    q = split(lin(query, wq, bq))
    k = split(lin(key, wk, bk))
    v = split(lin(value, wv, bv))

    scores = jnp.einsum("bhqd,bhkd->bhqk", q, k) / math.sqrt(d_k)
    if mask is not None:
        scores = scores + jnp.broadcast_to(mask, (B, S, S))[:, None].astype(
            jnp.float32) * (-1.0e9)
    p = jax.nn.softmax(scores, axis=-1)
    ctx = jnp.einsum("bhqk,bhkd->bhqd", p, v)
    ctx = ctx.transpose(0, 2, 1, 3).reshape(B, S, D)
    return lin(ctx, wo, bo)


if __name__ == "__main__":
    B, S, D, H = 2, 8, 32, 4      # batch, seq, d_model, num_heads (d_k = 8)

    key0 = jax.random.PRNGKey(0)
    ks = jax.random.split(key0, 12)

    def init_w(k):
        return (jax.random.uniform(k, (D, D), jnp.float32, -1.0, 1.0)
                / math.sqrt(D))

    def init_b(k):
        return jax.random.uniform(k, (D,), jnp.float32, -0.1, 0.1)

    params = (init_w(ks[0]), init_b(ks[1]),    # wq, bq
              init_w(ks[2]), init_b(ks[3]),    # wk, bk
              init_w(ks[4]), init_b(ks[5]),    # wv, bv
              init_w(ks[6]), init_b(ks[7]))    # dense (wo, bo)

    x = jax.random.normal(ks[8], (B, S, D), jnp.float32)
    q2 = jax.random.normal(ks[9], (B, S, D), jnp.float32)
    k2 = jax.random.normal(ks[10], (B, S, D), jnp.float32)
    mask01 = (jax.random.uniform(ks[11], (B, S, S)) > 0.7).astype(jnp.float32)

    # 1) self-attention, no mask, f32 compute (tight correctness check,
    #    exercises fused-QKV + maskless kernel variant)
    out_f32 = multi_headed_attention(x, x, x, params, num_heads=H,
                                     compute_dtype=jnp.float32)
    out_f32 = jax.block_until_ready(out_f32)
    ref = _reference(x, x, x, params, num_heads=H)
    assert out_f32.shape == (B, S, D)
    assert jnp.allclose(out_f32, ref, atol=1e-2, rtol=1e-2), "self-attn f32 mismatch"

    # 2) same path with bf16 MXU inputs / f32 accumulation (loose check)
    out_bf16 = multi_headed_attention(x, x, x, params, num_heads=H,
                                      compute_dtype=jnp.bfloat16)
    out_bf16 = jax.block_until_ready(out_bf16)
    assert jnp.allclose(out_bf16, ref, atol=1e-1, rtol=1e-1), "self-attn bf16 mismatch"

    # 3) distinct q/k/v with additive mask (general kernel variant), f32
    out_m = multi_headed_attention(q2, x, k2, params, num_heads=H, mask=mask01,
                                   compute_dtype=jnp.float32)
    out_m = jax.block_until_ready(out_m)
    ref_m = _reference(q2, x, k2, params, num_heads=H, mask=mask01)
    assert jnp.allclose(out_m, ref_m, atol=1e-2, rtol=1e-2), "masked attn mismatch"

    print("KERNEL_OK")
</pallas_src>

<mosaic_0001>
module attributes {stable_mosaic.version = 11 : i64} {
  func.func @kernel(%arg0: i32, %arg1: memref<1x8x32xf32, #tpu.memory_space<vmem>>, %arg2: memref<32x96xf32, #tpu.memory_space<vmem>>, %arg3: memref<1x96xf32, #tpu.memory_space<vmem>>, %arg4: memref<32x32xf32, #tpu.memory_space<vmem>>, %arg5: memref<1x32xf32, #tpu.memory_space<vmem>>, %arg6: memref<1x8x32xf32, #tpu.memory_space<vmem>>) attributes {dimension_semantics = [#tpu.dimension_semantics<parallel>], iteration_bounds = array<i64: 2>, scalar_prefetch = 0 : i64, scratch_operands = 0 : i64, tpu.core_type = #tpu.core_type<tc>, window_params = [{transform_indices = @transform_0, window_bounds = array<i64: 1, 8, 32>}, {pipeline_mode = #tpu.pipeline_mode<synchronous>, transform_indices = @transform_1, window_bounds = array<i64: 32, 96>}, {pipeline_mode = #tpu.pipeline_mode<synchronous>, transform_indices = @transform_2, window_bounds = array<i64: 1, 96>}, {pipeline_mode = #tpu.pipeline_mode<synchronous>, transform_indices = @transform_3, window_bounds = array<i64: 32, 32>}, {pipeline_mode = #tpu.pipeline_mode<synchronous>, transform_indices = @transform_4, window_bounds = array<i64: 1, 32>}, {transform_indices = @transform_5, window_bounds = array<i64: 1, 8, 32>}]} {
    %c0 = arith.constant 0 : index
    %c0_0 = arith.constant 0 : index
    %c0_1 = arith.constant 0 : index
    %0 = vector.load %arg1[%c0, %c0_0, %c0_1] : memref<1x8x32xf32, #tpu.memory_space<vmem>>, vector<1x8x32xf32>
    %1 = vector.shape_cast %0 : vector<1x8x32xf32> to vector<8x32xf32>
    %c0_2 = arith.constant 0 : index
    %c0_3 = arith.constant 0 : index
    %2 = vector.load %arg2[%c0_2, %c0_3] : memref<32x96xf32, #tpu.memory_space<vmem>>, vector<32x96xf32>
    %cst = arith.constant dense<0.000000e+00> : vector<8x96xf32>
    %3 = tpu.matmul %1, %2, %cst {dimension_numbers = #tpu.dot_dimension_numbers<[1], [0], [0], [1], [0, 0, 1, 1], [], []>} : vector<8x32xf32>, vector<32x96xf32>, vector<8x96xf32> -> vector<8x96xf32>
    %c0_4 = arith.constant 0 : index
    %c0_5 = arith.constant 0 : index
    %4 = vector.load %arg3[%c0_4, %c0_5] : memref<1x96xf32, #tpu.memory_space<vmem>>, vector<1x96xf32>
    %5 = vector.broadcast %4 : vector<1x96xf32> to vector<8x96xf32>
    %6 = arith.addf %3, %5 : vector<8x96xf32>
    %7 = vector.extract_strided_slice %6 {offsets = [0, 0], sizes = [8, 32], strides = [1, 1]} : vector<8x96xf32> to vector<8x32xf32>
    %cst_6 = arith.constant 0.353553385 : f32
    %8 = vector.broadcast %cst_6 : f32 to vector<8x32xf32>
    %9 = arith.mulf %7, %8 : vector<8x32xf32>
    %10 = vector.extract_strided_slice %6 {offsets = [0, 32], sizes = [8, 32], strides = [1, 1]} : vector<8x96xf32> to vector<8x32xf32>
    %11 = vector.extract_strided_slice %6 {offsets = [0, 64], sizes = [8, 32], strides = [1, 1]} : vector<8x96xf32> to vector<8x32xf32>
    %12 = vector.extract_strided_slice %9 {offsets = [0, 0], sizes = [8, 8], strides = [1, 1]} : vector<8x32xf32> to vector<8x8xf32>
    %13 = vector.extract_strided_slice %9 {offsets = [0, 8], sizes = [8, 8], strides = [1, 1]} : vector<8x32xf32> to vector<8x8xf32>
    %14 = vector.extract_strided_slice %9 {offsets = [0, 16], sizes = [8, 8], strides = [1, 1]} : vector<8x32xf32> to vector<8x8xf32>
    %15 = vector.extract_strided_slice %9 {offsets = [0, 24], sizes = [8, 8], strides = [1, 1]} : vector<8x32xf32> to vector<8x8xf32>
    %16 = vector.shape_cast %12 : vector<8x8xf32> to vector<1x8x8xf32>
    %17 = vector.shape_cast %13 : vector<8x8xf32> to vector<1x8x8xf32>
    %18 = vector.shape_cast %14 : vector<8x8xf32> to vector<1x8x8xf32>
    %19 = vector.shape_cast %15 : vector<8x8xf32> to vector<1x8x8xf32>
    %20 = tpu.concatenate %16, %17, %18, %19 in 0 : vector<1x8x8xf32>, vector<1x8x8xf32>, vector<1x8x8xf32>, vector<1x8x8xf32> -> vector<4x8x8xf32>
    %21 = vector.extract_strided_slice %10 {offsets = [0, 0], sizes = [8, 8], strides = [1, 1]} : vector<8x32xf32> to vector<8x8xf32>
    %22 = vector.extract_strided_slice %10 {offsets = [0, 8], sizes = [8, 8], strides = [1, 1]} : vector<8x32xf32> to vector<8x8xf32>
    %23 = vector.extract_strided_slice %10 {offsets = [0, 16], sizes = [8, 8], strides = [1, 1]} : vector<8x32xf32> to vector<8x8xf32>
    %24 = vector.extract_strided_slice %10 {offsets = [0, 24], sizes = [8, 8], strides = [1, 1]} : vector<8x32xf32> to vector<8x8xf32>
    %25 = vector.shape_cast %21 : vector<8x8xf32> to vector<1x8x8xf32>
    %26 = vector.shape_cast %22 : vector<8x8xf32> to vector<1x8x8xf32>
    %27 = vector.shape_cast %23 : vector<8x8xf32> to vector<1x8x8xf32>
    %28 = vector.shape_cast %24 : vector<8x8xf32> to vector<1x8x8xf32>
    %29 = tpu.concatenate %25, %26, %27, %28 in 0 : vector<1x8x8xf32>, vector<1x8x8xf32>, vector<1x8x8xf32>, vector<1x8x8xf32> -> vector<4x8x8xf32>
    %30 = vector.extract_strided_slice %11 {offsets = [0, 0], sizes = [8, 8], strides = [1, 1]} : vector<8x32xf32> to vector<8x8xf32>
    %31 = vector.extract_strided_slice %11 {offsets = [0, 8], sizes = [8, 8], strides = [1, 1]} : vector<8x32xf32> to vector<8x8xf32>
    %32 = vector.extract_strided_slice %11 {offsets = [0, 16], sizes = [8, 8], strides = [1, 1]} : vector<8x32xf32> to vector<8x8xf32>
    %33 = vector.extract_strided_slice %11 {offsets = [0, 24], sizes = [8, 8], strides = [1, 1]} : vector<8x32xf32> to vector<8x8xf32>
    %34 = vector.shape_cast %30 : vector<8x8xf32> to vector<1x8x8xf32>
    %35 = vector.shape_cast %31 : vector<8x8xf32> to vector<1x8x8xf32>
    %36 = vector.shape_cast %32 : vector<8x8xf32> to vector<1x8x8xf32>
    %37 = vector.shape_cast %33 : vector<8x8xf32> to vector<1x8x8xf32>
    %38 = tpu.concatenate %34, %35, %36, %37 in 0 : vector<1x8x8xf32>, vector<1x8x8xf32>, vector<1x8x8xf32>, vector<1x8x8xf32> -> vector<4x8x8xf32>
    "tpu.trace_start"() <{level = 10 : i32, message = "hqd,hkd->hqk"}> : () -> ()
    %cst_7 = arith.constant dense<0.000000e+00> : vector<4x8x8xf32>
    %39 = tpu.matmul %20, %29, %cst_7 {dimension_numbers = #tpu.dot_dimension_numbers<[2], [2], [1], [1], [0, 0, 0, 1, 1, 1], [0], [0]>} : vector<4x8x8xf32>, vector<4x8x8xf32>, vector<4x8x8xf32> -> vector<4x8x8xf32>
    "tpu.trace_stop"() : () -> ()
    %cst_8 = arith.constant dense<0xFF800000> : vector<4x8xf32>
    %40 = vector.multi_reduction <maximumf>, %39, %cst_8 [2] : vector<4x8x8xf32> to vector<4x8xf32>
    %41 = vector.shape_cast %40 : vector<4x8xf32> to vector<4x8x1xf32>
    %42 = vector.broadcast %41 : vector<4x8x1xf32> to vector<4x8x8xf32>
    %43 = arith.subf %39, %42 : vector<4x8x8xf32>
    %44 = math.exp %43 : vector<4x8x8xf32>
    %cst_9 = arith.constant dense<0.000000e+00> : vector<4x8xf32>
    %45 = vector.multi_reduction <add>, %44, %cst_9 [2] : vector<4x8x8xf32> to vector<4x8xf32>
    %46 = vector.shape_cast %45 : vector<4x8xf32> to vector<4x8x1xf32>
    %47 = tpu.reciprocal %46 {approx = true} : vector<4x8x1xf32> -> vector<4x8x1xf32>
    %48 = vector.broadcast %47 : vector<4x8x1xf32> to vector<4x8x8xf32>
    %49 = arith.mulf %44, %48 : vector<4x8x8xf32>
    "tpu.trace_start"() <{level = 10 : i32, message = "hqk,hkd->hqd"}> : () -> ()
    %cst_10 = arith.constant dense<0.000000e+00> : vector<4x8x8xf32>
    %50 = tpu.matmul %49, %38, %cst_10 {dimension_numbers = #tpu.dot_dimension_numbers<[2], [1], [1], [2], [0, 0, 0, 1, 1, 2], [0], [0]>} : vector<4x8x8xf32>, vector<4x8x8xf32>, vector<4x8x8xf32> -> vector<4x8x8xf32>
    "tpu.trace_stop"() : () -> ()
    %51 = vector.extract_strided_slice %50 {offsets = [0, 0, 0], sizes = [1, 8, 8], strides = [1, 1, 1]} : vector<4x8x8xf32> to vector<1x8x8xf32>
    %52 = vector.shape_cast %51 : vector<1x8x8xf32> to vector<8x8xf32>
    %53 = vector.extract_strided_slice %50 {offsets = [1, 0, 0], sizes = [1, 8, 8], strides = [1, 1, 1]} : vector<4x8x8xf32> to vector<1x8x8xf32>
    %54 = vector.shape_cast %53 : vector<1x8x8xf32> to vector<8x8xf32>
    %55 = vector.extract_strided_slice %50 {offsets = [2, 0, 0], sizes = [1, 8, 8], strides = [1, 1, 1]} : vector<4x8x8xf32> to vector<1x8x8xf32>
    %56 = vector.shape_cast %55 : vector<1x8x8xf32> to vector<8x8xf32>
    %57 = vector.extract_strided_slice %50 {offsets = [3, 0, 0], sizes = [1, 8, 8], strides = [1, 1, 1]} : vector<4x8x8xf32> to vector<1x8x8xf32>
    %58 = vector.shape_cast %57 : vector<1x8x8xf32> to vector<8x8xf32>
    %59 = tpu.concatenate %52, %54, %56, %58 in 1 : vector<8x8xf32>, vector<8x8xf32>, vector<8x8xf32>, vector<8x8xf32> -> vector<8x32xf32>
    %c0_11 = arith.constant 0 : index
    %c0_12 = arith.constant 0 : index
    %60 = vector.load %arg4[%c0_11, %c0_12] : memref<32x32xf32, #tpu.memory_space<vmem>>, vector<32x32xf32>
    %cst_13 = arith.constant dense<0.000000e+00> : vector<8x32xf32>
    %61 = tpu.matmul %59, %60, %cst_13 {dimension_numbers = #tpu.dot_dimension_numbers<[1], [0], [0], [1], [0, 0, 1, 1], [], []>} : vector<8x32xf32>, vector<32x32xf32>, vector<8x32xf32> -> vector<8x32xf32>
    %c0_14 = arith.constant 0 : index
    %c0_15 = arith.constant 0 : index
    %62 = vector.load %arg5[%c0_14, %c0_15] : memref<1x32xf32, #tpu.memory_space<vmem>>, vector<1x32xf32>
    %63 = vector.broadcast %62 : vector<1x32xf32> to vector<8x32xf32>
    %64 = arith.addf %61, %63 : vector<8x32xf32>
    %65 = vector.shape_cast %64 : vector<8x32xf32> to vector<1x8x32xf32>
    %c0_16 = arith.constant 0 : index
    %c0_17 = arith.constant 0 : index
    %c0_18 = arith.constant 0 : index
    %66 = vector.load %arg6[%c0_16, %c0_17, %c0_18] : memref<1x8x32xf32, #tpu.memory_space<vmem>>, vector<1x8x32xf32>
    tpu.vector_store %arg6[%c0_16, %c0_17, %c0_18], %65 {strides = array<i32>} : memref<1x8x32xf32, #tpu.memory_space<vmem>>, vector<1x8x32xf32>,
    return
  }
  func.func @transform_0(%arg0: i32) -> (i32, i32, i32) {
    %c0_i32 = arith.constant 0 : i32
    %c0_i32_0 = arith.constant 0 : i32
    %c0_i32_1 = arith.constant 0 : i32
    return %arg0, %c0_i32, %c0_i32_0 : i32, i32, i32
  }
  func.func @transform_1(%arg0: i32) -> (i32, i32) {
    %c0_i32 = arith.constant 0 : i32
    %c0_i32_0 = arith.constant 0 : i32
    %c0_i32_1 = arith.constant 0 : i32
    return %c0_i32, %c0_i32_0 : i32, i32
  }
  func.func @transform_2(%arg0: i32) -> (i32, i32) {
    %c0_i32 = arith.constant 0 : i32
    %c0_i32_0 = arith.constant 0 : i32
    %c0_i32_1 = arith.constant 0 : i32
    return %c0_i32, %c0_i32_0 : i32, i32
  }
  func.func @transform_3(%arg0: i32) -> (i32, i32) {
    %c0_i32 = arith.constant 0 : i32
    %c0_i32_0 = arith.constant 0 : i32
    %c0_i32_1 = arith.constant 0 : i32
    return %c0_i32, %c0_i32_0 : i32, i32
  }
  func.func @transform_4(%arg0: i32) -> (i32, i32) {
    %c0_i32 = arith.constant 0 : i32
    %c0_i32_0 = arith.constant 0 : i32
    %c0_i32_1 = arith.constant 0 : i32
    return %c0_i32, %c0_i32_0 : i32, i32
  }
  func.func @transform_5(%arg0: i32) -> (i32, i32, i32) {
    %c0_i32 = arith.constant 0 : i32
    %c0_i32_0 = arith.constant 0 : i32
    %c0_i32_1 = arith.constant 0 : i32
    return %arg0, %c0_i32, %c0_i32_0 : i32, i32, i32
  }
}

</mosaic_0001>

<bundles_post_ra>
// kernel: tpu_custom_call.1
= control target key start
LH: loop header
LB: loop body
LE: loop exit
PB: predicated region body
PF: predicated region fallthrough
CT: control target
= control target key end

     0   :  { %10 = vsyncpa [#allocation3], 0  ;;  %s1896_s0 = inlined_call_operand.hbm [shape: f32[2,8,32], index: 0, kind: input, shape index: {}]   ;;  %s1897_s1 = inlined_call_operand.hbm [shape: f32[32,96], index: 1, kind: input, shape index: {}]   ;;  %s1898_s2 = inlined_call_operand.vmem [shape: f32[1,96], index: 2, kind: input, shape index: {}]   ;;  %s1899_s3 = inlined_call_operand.hbm [shape: f32[32,32], index: 3, kind: input, shape index: {}]   ;;  %s1900_s4 = inlined_call_operand.vmem [shape: f32[1,32], index: 4, kind: input, shape index: {}]   ;;  %s1901_s5 = inlined_call_operand.hbm [shape: f32[2,8,32], index: 5, kind: output, shape index: {}]  }
   0x1   :  { %12 = vsyncpa [#allocation3 + $0x1], 0 }
   0x2   :  { %13 = vsyncpa [#allocation6], 0 }
   0x3   :  { %14 = vsyncpa [#allocation4], 0 }
   0x4   :  { %16 = vsyncpa [#allocation4 + $0x1], 0  ;;  %s1639_s18 = smov 0   ;;  %s1641_s19 = smov 0  }
   0x5   :  { %s1643_s20 = smov 0   ;;  %s1645_s21 = smov 0  }
   0x6 LB: > { %s1660_s22 = sadd.s32 4294967295, %s1591_s21   ;;  %s1228_s23 = sadd.s32 4294967294, %s1591_s21   ;;  %s1591_s21 = sphi %s1645_s21, %s1923_s21   ;;  %s1587_s20 = sphi %s1643_s20, %s1922_s20   ;;  %s1583_s19 = sphi %s1641_s19, %s1921_s19   ;;  %s1579_s18 = sphi %s1639_s18, %s1920_s18  }
   0x7   : > { %p42_p0 = scmp.ne.s32.totalorder %s1583_s19, %s1579_s18  ;;  %p1902_p1 = scmp.eq.s32.totalorder %s1660_s22, 0 }
   0x8   : > { %p156_p3 = scmp.eq.s32.totalorder %s1228_s23, 1  ;;  %p1229_p5 = scmp.ge.s32.totalorder %s1591_s21, 1 }
   0x9   : > { %p1669_p4 = por %p1902_p1, %p42_p0  ;;  %p163_p7 = scmp.lt.s32.totalorder %s1591_s21, 3 }
   0xa   : > { %p1674_p6 = por %p156_p3, %p42_p0  ;;  %s1593_s27 = smov [#allocation5]  }
   0xb   : > { %s1906_s24 = scalar_select %p1669_p4, 1, 0 }
   0xc   : > { %s1907_s25 = scalar_select %p1674_p6, 1, 0 }
   0xd   : > { %p1679_p8 = pnand %p1229_p5, %p163_p7  ;;  %s175_s28 = sshll.u32 %s1593_s27, 4  ;;  %s176_s28 = int_to_ptr.vmem [resolvable:$true] %s175_s28 }
   0xe   : > { %s1594_s30 = smov [#allocation7]   ;;  %s1454_s7 = scalar_lea.vmem %s176_s28, 512 }
   0xf   : > { %s1908_s26 = scalar_select %p1679_p8, 1, 0 }
  0x10   : > { %p1360_p9 = pneg %p1679_p8  ;;  %s191_s6 = sshll.u32 %s1594_s30, 4  ;;  %s192_s6 = int_to_ptr.vmem [resolvable:$true] %s191_s6 }
  0x11   : > { %p1455_p13 = scmp.ne.s32.totalorder %s176_s28, %s1454_s7  ;;  %p1462_p5 = scmp.lt.s32.totalorder %s176_s28, %s176_s28 }
  0x12   : > { %p1688_p11 = pnand %p1360_p9, %p1902_p1  ;;  %p1463_p7 = scmp.lt.s32.totalorder %s1454_s7, %s1454_s7 }
  0x14   : > { %p1445_p12 = pneg %p1688_p11  ;;  %p1464_p10 = por %p1463_p7, %p1462_p5 }
  0x16   : > { %p1457_p0 = pnand %p1455_p13, %p1445_p12 }
  0x18   : > { %p1458_p3 = pneg %p1457_p0 }
  0x1a   : > { %p1465_p9 = pnand %p1464_p10, %p1458_p3 }
  0x1c   : > { %1468 = shalt.err (!%p1465_p9)
}
  0x1d   : > { %s1595_s8 = smov 128   ;;  %s1596_s9 = smov 8  }
  0x1e   : > { %1363 = dma.hbm_to_vmem [thread:$0]  (!%p1688_p11), %s1897_s1, 512, %s176_s28, [#allocation6], %s1595_s8, %s1595_s8, %s1596_s9  }
  0x1f   : > { %s1480_s12 = scalar_lea.vmem %s192_s6, 512  ;;  %p1488_p2 = scmp.lt.s32.totalorder %s192_s6, %s192_s6 }
  0x20   : > { %p1481_p1 = scmp.ne.s32.totalorder %s192_s6, %s1480_s12  ;;  %p1489_p6 = scmp.lt.s32.totalorder %s1480_s12, %s1480_s12 }
  0x22   : > { %p1483_p13 = pnand %p1481_p1, %p1445_p12  ;;  %p1490_p5 = por %p1489_p6, %p1488_p2 }
  0x24   : > { %p1484_p0 = pneg %p1483_p13 }
  0x26   : > { %p1491_p10 = pnand %p1490_p5, %p1484_p0 }
  0x28   : > { %1494 = shalt.err (!%p1491_p10)
}
  0x29   : > { %1366 = dma.hbm_to_vmem [thread:$0]  (!%p1688_p11), %s1899_s3, 512, %s192_s6, [#allocation6], %s1595_s8, %s1595_s8, %s1596_s9  }
  0x2a   : > { %s1711_s15 = sadd.s32 1, %s1591_s21   ;;  %s29_s16 = sadd.s32 1, %s1587_s20 }
  0x2b   : > { %s26_s17 = ssub.s32 %s1591_s21, %s1711_s15  ;;  %p36_p1 = scmp.ne.s32.totalorder %s1587_s20, %s1583_s19 }
  0x2c   : > { %p27_p2 = scmp.eq.s32.totalorder %s26_s17, 0  ;;  %p37_p6 = scmp.eq.s32.totalorder %s1591_s21, 0 }
  0x2d   : > { %p1910_p12 = scmp.eq.s32.totalorder %s1660_s22, 1  ;;  %p1377_p7 = scmp.lt.s32.totalorder %s1591_s21, 2 }
  0x2e   : > { %s1727_s27 = scalar_select %p27_p2, %s1587_s20, %s29_s16  }
  0x2f   : > { %p1721_p3 = por %p1910_p12, %p36_p1  ;;  %p38_p9 = por %p37_p6, %p36_p1 }
  0x30   : > { %s208_s28 = sand.u32 1, %s1587_s20   ;;  %s1234_s30 = sshll.u32 %s1591_s21, 7 }
  0x31   : > { %s1911_s23 = scalar_select %p1721_p3, 1, 0 }
  0x32   : > { %s1233_s29 = sshll.u32 %s208_s28, 3  ;;  %s1734_s8 = scalar_lea.hbm %s1896_s0, %s1234_s30 }
  0x33   : > { %s212_s9 = scalar_lea.vmem [#allocation2], %s1233_s29  ;;  %p1736_p11 = pnand %p1377_p7, %p38_p9 }
  0x34   : > { %s219_s10 = sshll.u32 %s212_s9, 4  ;;  %s209_s12 = scalar_lea.sflag [#allocation3], %s208_s28  ;;  %s220_s10 = int_to_ptr.vmem [resolvable:$true] %s219_s10 }
  0x35   : > { %s1495_s13 = scalar_lea.hbm %s1734_s8, 128  ;;  %p1497_p0 = pneg %p1736_p11 }
  0x36   : > { %p1496_p13 = scmp.ne.s32.totalorder %s1734_s8, %s1495_s13  ;;  %s1500_s17 = scalar_lea.hbm %s1896_s0, 256 }
  0x37   : > { %p1501_p1 = scmp.lt.s32.totalorder %s1734_s8, %s1896_s0  ;;  %p1502_p2 = scmp.lt.s32.totalorder %s1500_s17, %s1495_s13 }
  0x38   : > { %p1498_p5 = pnand %p1497_p0, %p1496_p13 }
  0x39   : > { %p1503_p6 = por %p1502_p2, %p1501_p1 }
  0x3a   : > { %p1499_p10 = pneg %p1498_p5 }
  0x3c   : > { %p1504_p12 = pnand %p1503_p6, %p1499_p10 }
  0x3e   : > { %1507 = shalt.err (!%p1504_p12)
}
  0x3f   : > { %s1508_s6 = scalar_lea.vmem %s220_s10, 128  ;;  %s1597_s28 = smov [#allocation2]  }
  0x40   : > { %p1509_p7 = scmp.ne.s32.totalorder %s220_s10, %s1508_s6  ;;  %s1513_s7 = sshll.u32 %s1597_s28, 4  ;;  %s1514_s7 = int_to_ptr.vmem [resolvable:$false] %s1513_s7 }
  0x41   : > { %s1515_s9 = scalar_lea.vmem %s1514_s7, 256  ;;  %p1516_p13 = scmp.lt.s32.totalorder %s220_s10, %s1514_s7 }
  0x42   : > { %p1511_p9 = pnand %p1509_p7, %p1497_p0  ;;  %p1517_p5 = scmp.lt.s32.totalorder %s1515_s9, %s1508_s6 }
  0x44   : > { %p1512_p3 = pneg %p1511_p9  ;;  %p1518_p4 = por %p1517_p5, %p1516_p13 }
  0x46   : > { %p1519_p8 = pnand %p1518_p4, %p1512_p3 }
  0x48   : > { %1522 = shalt.err (!%p1519_p8)
}
  0x49   : > { %1370 = dma.hbm_to_vmem [thread:$0]  (!%p1736_p11), %s1734_s8, 128, %s220_s10, %s209_s12  }
  0x4a   : > { %p1913_p10 = scmp.ne.s32.totalorder %s1908_s26, 0 }
  0x4b   : > { %s1757_s13 = sand.u32 (!%p1913_p10), 1, %s1583_s19   ;;  %p1914_p4 = scmp.ne.s32.totalorder (!%p1913_p10), %s1906_s24, 0 }
  0x4c   : > { %228 = sbr.rel (%p1913_p10) target bundleno = 1553 (0x611), region = 40  ;;  %s1236_s14 = sshll.u32 (!%p1913_p10), %s1757_s13, 3 }
  0x4d   : > { %s231_s16 = scalar_lea.sflag (!%p1913_p10), [#allocation3], %s1757_s13  ;;  %s234_s17 = scalar_lea.vmem (!%p1913_p10), [#allocation2], %s1236_s14 }
  0x51   : > { %1566 = dma.done.wait (%p1914_p4), %s231_s16, 128  }
  0x52   : > { %1568 = vsyncadd (%p1914_p4), %s231_s16, 4294967168  ;;  %p1915_p8 = scmp.eq.s32.totalorder %s1660_s22, 0 }
  0x54   : > { %1570 = dma.done.wait (%p1915_p8), [#allocation6], 1024   ;;  %p1916_p3 = pmov %p1915_p8 }
  0x55   : > { %v1598_v0 = vmov 0.0   ;;  %vm1599_vm0 = vmmov 0   ;;  %v273_v1 = vld [vmem:[#allocation5 + $0x18] sm:$0xff]  ;;  %v272_v2 = vld [vmem:[#allocation5 + $0x10] sm:$0xff]  ;;  %v271_v3 = vld [vmem:[#allocation5 + $0x8] sm:$0xff]  ;;  %vm281_vm1 = vcmask 261120  }
  0x56   : > { %1572 = vsyncadd (%p1916_p3), [#allocation6], 4294966272  ;;  %1286 = vmatprep.subr.mxu0 %v1598_v0  ;;  %1294 = vmatprep.mubr.msk.f32.mxu0 %vm1599_vm0, %v1598_v0  ;;  %v270_v4 = vld [vmem:[#allocation5] sm:$0xff]  ;;  %v269_v5 = vld [vmem:[%s234_s17] sm:$0xff]  ;;  %s1600_s8 = smov 104   ;;  %s1601_s10 = smov 120  }
  0x57   : > { %1297 = vmatprep.subr.mxu1 %v1598_v0  ;;  %1299 = vmatprep.mubr.msk.f32.mxu1 %vm1599_vm0, %v1598_v0  ;;  %v1240_v6 = vld [vmem:[%s1898_s2] ss:$0 sm:$0xff]  ;;  %s1602_s11 = smov 96   ;;  %s1603_s12 = smov 112   ;;  %vm372_vm2 = vcmask 64512   ;;  %vm1036_vm3 = vcmask 130048  }
  0x58   : > { %1287 = vmatpush3.msra.mxu0 %v273_v1  ;;  %s1604_s30 = smov 64   ;;  %s1605_s29 = smov 8   ;;  %vm1038_vm4 = vcmask 195584  }
  0x59   : > { %1288 = vmatprep.subr.mxu0 %v1598_v0  ;;  %s1606_s6 = smov 16   ;;  %s1607_s28 = smov 24  }
  0x5a   : > { %1289 = vmatpush3.msra.mxu0 %v272_v2  ;;  %s1257_s16 = sshll.u32 %s1660_s22, 7  ;;  %s268_s17 = scalar_lea.vmem [#allocation8], %s1236_s14 }
  0x5b   : > { %1290 = vmatprep.subr.mxu0 %v1598_v0  ;;  %s1139_s24 = sshll.u32 %s268_s17, 4  ;;  %p1917_p0 = scmp.ne.s32.totalorder %s1911_s23, 0  ;;  %s1140_s24 = int_to_ptr.vmem [resolvable:$true] %s1139_s24 }
  0x5c   : > { %1291 = vmatpush3.msra.mxu0 %v271_v3  ;;  %s1608_s22 = smov [#allocation8]  }
  0x5d   : > { %1292 = vmatprep.subr.mxu0 %v1598_v0  ;;  %s1527_s14 = sshll.u32 %s1608_s22, 4  ;;  %s1528_s14 = int_to_ptr.vmem [resolvable:$false] %s1527_s14 }
  0x5e   : > { %1293 = vmatpush3.msra.mxu0 %v270_v4  ;;  %p1530_p6 = scmp.lt.s32.totalorder %s1140_s24, %s1528_s14 }
  0x5f   : > { %1295 = vmatmul.mubr.msk.f32.vlgmr.msra.gmra.mxu0 %vm281_vm1, %v269_v5  ;;  %1317 = vmatprep.subr.mxu0 %v1598_v0 }
  0x60   : > { %1319 = vmatprep.mubr.msk.f32.mxu0 %vm1599_vm0, %v1598_v0 }
 0x11f   : > { %v351_v7 = vpop.f32.mrf.mxu0 }
 0x120   : > { %v352_v8 = vadd.f32 %v1240_v6, %v351_v7 }
 0x121   : > { %v1296_v9 = vpop.f32.mrf.mxu0 }
 0x122   : > { %368 = vrot.lane.b32.xlu1 %v352_v8, %s1600_s8  ;;  %364 = vrot.lane.b32.xlu0 %v352_v8, %s1601_s10  ;;  %v355_v10 = vmul.f32 0.35355338, %v352_v8  ;;  %v1042_v9 = vld [vmem:[#allocation7 + $0x10] sm:$0xff] }
 0x126   : > { %370 = vrot.lane.b32.xlu1 %v352_v8, %s1602_s11  ;;  %366 = vrot.lane.b32.xlu0 %v352_v8, %s1603_s12 }
 0x12a   : > { %357 = vrot.lane.b32.xlu1 %v355_v10, %s1601_s10  ;;  %s1858_s10 = scalar_lea.hbm %s1901_s5, %s1257_s16 }
 0x12e   : > { %359 = vrot.lane.b32.xlu1 %v355_v10, %s1603_s12  ;;  %s1523_s12 = scalar_lea.vmem %s1140_s24, 128 }
 0x12f   : > { %p1524_p11 = scmp.ne.s32.totalorder %s1140_s24, %s1523_s12 }
 0x131   : > { %p1525_p1 = pnand %p1524_p11, %p1917_p0 }
 0x132   : > { %361 = vrot.lane.b32.xlu1 %v355_v10, %s1600_s8 }
 0x133   : > { %p1526_p2 = pneg %p1525_p1 }
 0x194   : > { %v1787_v11 = vpop.permute.xlu1 %368  ;;  %v1789_v12 = vpop.permute.xlu0 %364 }
 0x195   : > { %447 = vrot.lane.b32.xlu0 %v1789_v12, %s1602_s11 }
 0x198   : > { %v371_v13 = vpop.permute.xlu1 %370  ;;  %v1792_v14 = vpop.permute.xlu0 %366 }
 0x199   : > { %1298 = vmatpush3.xpose.msk.msra.mxu1 %vm372_vm2, %v371_v13  ;;  %523 = vrot.lane.b32.xlu0 %v1792_v14, %s1602_s11 }
 0x19a   : > { %1302 = vmatprep.subr.mxu1 %v1598_v0 }
 0x19c   : > { %1300 = vmatmul.mubr.msk.f32.vlgmr.msra.gmra.mxu1 %vm372_vm2, %v355_v10  ;;  %v358_v15 = vpop.permute.xlu1 %357  ;;  %v1041_v10 = vld [vmem:[#allocation7 + $0x8] sm:$0xff] }
 0x19d   : > { %599 = vrot.lane.b32.xlu0 %v1787_v11, %s1602_s11  ;;  %1304 = vmatprep.mubr.msk.f32.mxu1 %vm1599_vm0, %v1598_v0  ;;  %s1126_s11 = scalar_lea.sflag [#allocation4], %s1757_s13 }
 0x1a0   : > { %v360_v18 = vpop.permute.xlu1 %359 }
 0x1a4   : > { %v362_v20 = vpop.permute.xlu1 %361 }
 0x207   : > { %v448_v16 = vpop.permute.xlu0 %447 }
 0x208   : > { %1303 = vmatpush3.xpose.msk.msra.mxu1 %vm372_vm2, %v448_v16 }
 0x209   : > { %1307 = vmatprep.subr.mxu1 %v1598_v0 }
 0x20b   : > { %v524_v17 = vpop.permute.xlu0 %523  ;;  %1305 = vmatmul.mubr.msk.f32.vlgmr.msra.gmra.mxu1 %vm372_vm2, %v358_v15 }
 0x20c   : > { %1308 = vmatpush3.xpose.msk.msra.mxu1 %vm372_vm2, %v524_v17  ;;  %1309 = vmatprep.mubr.msk.f32.mxu1 %vm1599_vm0, %v1598_v0 }
 0x20d   : > { %1312 = vmatprep.subr.mxu1 %v1598_v0 }
 0x20f   : > { %v600_v19 = vpop.permute.xlu0 %599  ;;  %1310 = vmatmul.mubr.msk.f32.vlgmr.msra.gmra.mxu1 %vm372_vm2, %v360_v18 }
 0x210   : > { %1313 = vmatpush3.xpose.msk.msra.mxu1 %vm372_vm2, %v600_v19  ;;  %1314 = vmatprep.mubr.msk.f32.mxu1 %vm1599_vm0, %v1598_v0 }
 0x211   : > { %1322 = vmatprep.subr.mxu1 %v1598_v0 }
 0x213   : > { %1315 = vmatmul.mubr.msk.f32.vlgmr.msra.gmra.mxu1 %vm372_vm2, %v362_v20 }
 0x214   : > { %1324 = vmatprep.mubr.msk.f32.mxu1 %vm1599_vm0, %v1598_v0 }
 0x25c   : > { %v443_v21 = vpop.f32.mrf.mxu1 }
 0x25d   : > { %v675_v22 = vsel %vm372_vm2, %v443_v21, -inf }
 0x25e   : > { %676 = vmax.xlane.f32.xlu0 %v675_v22  ;;  %v1301_v23 = vpop.f32.mrf.mxu1 }
 0x25f   : > { %v1254_v23 = vld [vmem:[%s1900_s4] ss:$0 sm:$0xff] }
 0x2cb   : > { %v519_v24 = vpop.f32.mrf.mxu1 }
 0x2cc   : > { %v678_v25 = vsel %vm372_vm2, %v519_v24, -inf }
 0x2cd   : > { %679 = vmax.xlane.f32.xlu1 %v678_v25  ;;  %v1306_v26 = vpop.f32.mrf.mxu1 }
 0x2cf   : > { %v595_v27 = vpop.f32.mrf.mxu1 }
 0x2d0   : > { %v681_v28 = vsel %vm372_vm2, %v595_v27, -inf }
 0x2d1   : > { %682 = vmax.xlane.f32.xlu0 %v681_v28  ;;  %v1311_v29 = vpop.f32.mrf.mxu1 }
 0x2d3   : > { %v671_v30 = vpop.f32.mrf.mxu1 }
 0x2d4   : > { %v684_v31 = vsel %vm372_vm2, %v671_v30, -inf }
 0x2d5   : > { %685 = vmax.xlane.f32.xlu0 %v684_v31  ;;  %v1316_v32 = vpop.f32.mrf.mxu1 }
 0x2de   : > { %719 = vrot.lane.b32.xlu1 %v352_v8, %s1604_s30  ;;  %v1043_v8 = vld [vmem:[#allocation7 + $0x18] sm:$0xff] }
 0x2e7   : > { %v677_v33 = vpop.xlane.xlu0 %676 }
 0x2e8   : > { %v687_v34 = vsub.f32 %v443_v21, %v677_v33 }
 0x2ea   : > { %v691_v35 = vmul.f32 1.442695, %v687_v34 }
 0x2ec   : > { %1427 = vpow2.f32 %v691_v35 }
 0x2f9   : > { %v1428_v36 = vpop.eup %1427 }
 0x2fa   : > { %v699_v37 = vsel %vm372_vm2, %v1428_v36, 0.0 }
 0x302   : > { %700 = vadd.xlane.f32.xlu1 %v699_v37 }
 0x356   : > { %v680_v38 = vpop.xlane.xlu1 %679 }
 0x357   : > { %v688_v39 = vsub.f32 %v519_v24, %v680_v38 }
 0x359   : > { %v693_v40 = vmul.f32 1.442695, %v688_v39 }
 0x35a   : > { %v720_v41 = vpop.permute.xlu1 %719  ;;  %v683_v42 = vpop.xlane.xlu0 %682 }
 0x35b   : > { %1429 = vpow2.f32 %v693_v40  ;;  %v689_v43 = vsub.f32 %v595_v27, %v683_v42  ;;  %1318 = vmatpush3.msra.mxu0 %v720_v41 }
 0x35c   : > { %1327 = vmatprep.subr.mxu0 %v1598_v0 }
 0x35d   : > { %v695_v44 = vmul.f32 1.442695, %v689_v43 }
 0x35e   : > { %v686_v45 = vpop.xlane.xlu0 %685 }
 0x35f   : > { %1431 = vpow2.f32 %v695_v44  ;;  %v690_v46 = vsub.f32 %v671_v30, %v686_v45 }
 0x361   : > { %v697_v47 = vmul.f32 1.442695, %v690_v46 }
 0x363   : > { %1433 = vpow2.f32 %v697_v47 }
 0x368   : > { %v1430_v48 = vpop.eup %1429 }
 0x369   : > { %v702_v49 = vsel %vm372_vm2, %v1430_v48, 0.0 }
 0x36a   : > { %703 = vadd.xlane.f32.xlu0 %v702_v49 }
 0x36c   : > { %v1432_v50 = vpop.eup %1431 }
 0x36d   : > { %v705_v51 = vsel %vm372_vm2, %v1432_v50, 0.0 }
 0x36e   : > { %706 = vadd.xlane.f32.xlu1 %v705_v51 }
 0x370   : > { %v1434_v52 = vpop.eup %1433 }
 0x371   : > { %v708_v53 = vsel %vm372_vm2, %v1434_v52, 0.0 }
 0x372   : > { %709 = vadd.xlane.f32.xlu0 %v708_v53 }
 0x37f   : > { %871 = vrot.lane.b32.xlu1 %v1792_v14, %s1604_s30 }
 0x383   : > { %947 = vrot.lane.b32.xlu1 %v1787_v11, %s1604_s30  ;;  %v1040_v11 = vld [vmem:[#allocation7] sm:$0xff] }
 0x388   : > { %795 = vrot.lane.b32.xlu0 %v1789_v12, %s1604_s30  ;;  %s1529_s30 = scalar_lea.vmem %s1528_s14, 256 }
 0x389   : > { %p1531_p12 = scmp.lt.s32.totalorder %s1529_s30, %s1523_s12 }
 0x38b   : > { %v701_v54 = vpop.xlane.xlu1 %700  ;;  %p1532_p7 = por %p1531_p12, %p1530_p6 }
 0x38c   : > { %1435 = vrcp.f32 %v701_v54 }
 0x38d   : > { %p1533_p9 = pnand %p1532_p7, %p1526_p2 }
 0x399   : > { %v1436_v55 = vpop.eup %1435 }
 0x39a   : > { %v715_v56 = vmul.f32 %v1436_v55, %v1428_v36 }
 0x39c   : > { %1320 = vmatmul.mubr.msk.f32.vlgmr.msra.gmra.mxu0 %vm372_vm2, %v715_v56 }
 0x39d   : > { %1329 = vmatprep.mubr.msk.f32.mxu0 %vm1599_vm0, %v1598_v0 }
 0x3f3   : > { %v704_v57 = vpop.xlane.xlu0 %703 }
 0x3f4   : > { %1437 = vrcp.f32 %v704_v57 }
 0x3f7   : > { %v707_v58 = vpop.xlane.xlu1 %706 }
 0x3f8   : > { %1439 = vrcp.f32 %v707_v58 }
 0x3fb   : > { %v872_v59 = vpop.permute.xlu1 %871  ;;  %v710_v60 = vpop.xlane.xlu0 %709 }
 0x3fc   : > { %1441 = vrcp.f32 %v710_v60  ;;  %1328 = vmatpush3.msra.mxu0 %v872_v59 }
 0x3fd   : > { %1337 = vmatprep.subr.mxu0 %v1598_v0 }
 0x3ff   : > { %v796_v61 = vpop.permute.xlu0 %795  ;;  %v948_v1 = vpop.permute.xlu1 %947 }
 0x400   : > { %1323 = vmatpush3.msra.mxu1 %v796_v61 }
 0x401   : > { %v1438_v62 = vpop.eup %1437  ;;  %1332 = vmatprep.subr.mxu1 %v1598_v0 }
 0x402   : > { %v716_v63 = vmul.f32 %v1438_v62, %v1430_v48 }
 0x404   : > { %1325 = vmatmul.mubr.msk.f32.vlgmr.msra.gmra.mxu1 %vm372_vm2, %v716_v63 }
 0x405   : > { %v1440_v2 = vpop.eup %1439  ;;  %1333 = vmatpush3.msra.mxu1 %v948_v1  ;;  %1334 = vmatprep.mubr.msk.f32.mxu1 %vm1599_vm0, %v1598_v0 }
 0x406   : > { %v717_v3 = vmul.f32 %v1440_v2, %v1432_v50 }
 0x408   : > { %1330 = vmatmul.mubr.msk.f32.vlgmr.msra.gmra.mxu0 %vm372_vm2, %v717_v3 }
 0x409   : > { %v1442_v4 = vpop.eup %1441  ;;  %1345 = vmatprep.mubr.msk.f32.mxu0 %vm1599_vm0, %v1598_v0  ;;  %1338 = vmatpush3.msra.mxu0 %v1043_v8 }
 0x40a   : > { %v718_v5 = vmul.f32 %v1442_v4, %v1434_v52  ;;  %1339 = vmatprep.subr.mxu0 %v1598_v0 }
 0x40b   : > { %1340 = vmatpush3.msra.mxu0 %v1042_v9 }
 0x40c   : > { %1335 = vmatmul.mubr.msk.f32.vlgmr.msra.gmra.mxu1 %vm372_vm2, %v718_v5  ;;  %1341 = vmatprep.subr.mxu0 %v1598_v0 }
 0x40d   : > { %1342 = vmatpush3.msra.mxu0 %v1041_v10 }
 0x40e   : > { %1343 = vmatprep.subr.mxu0 %v1598_v0 }
 0x40f   : > { %1344 = vmatpush3.msra.mxu0 %v1040_v11 }
 0x45c   : > { %v791_v6 = vpop.f32.mrf.mxu0 }
 0x45e   : > { %v1321_v7 = vpop.f32.mrf.mxu0 }
 0x4c4   : > { %v867_v12 = vpop.f32.mrf.mxu1 }
 0x4c5   : > { %1024 = vrot.lane.b32.xlu0 %v867_v12, %s1605_s29 }
 0x4c6   : > { %v1326_v13 = vpop.f32.mrf.mxu1 }
 0x4c8   : > { %v943_v14 = vpop.f32.mrf.mxu0 }
 0x4c9   : > { %1028 = vrot.lane.b32.xlu1 %v943_v14, %s1606_s6 }
 0x4ca   : > { %v1331_v15 = vpop.f32.mrf.mxu0 }
 0x4cc   : > { %v1019_v16 = vpop.f32.mrf.mxu1 }
 0x4cd   : > { %1032 = vrot.lane.b32.xlu0 %v1019_v16, %s1607_s28 }
 0x4ce   : > { %v1336_v17 = vpop.f32.mrf.mxu1 }
 0x537   : > { %v1025_v18 = vpop.permute.xlu0 %1024 }
 0x538   : > { %v1035_v0 = vsel %vm372_vm2, %v791_v6, %v1025_v18 }
 0x53b   : > { %v1029_v19 = vpop.permute.xlu1 %1028 }
 0x53c   : > { %v1037_v20 = vsel %vm1036_vm3, %v1035_v0, %v1029_v19 }
 0x53f   : > { %v1033_v21 = vpop.permute.xlu0 %1032 }
 0x540   : > { %v1039_v22 = vsel %vm1038_vm4, %v1037_v20, %v1033_v21 }
 0x541   : > { %1346 = vmatmul.mubr.msk.f32.vlgmr.msra.gmra.mxu0 %vm281_vm1, %v1039_v22 }
 0x601   : > { %v1120_v24 = vpop.f32.mrf.mxu0 }
 0x602   : > { %v1121_v25 = vadd.f32 %v1254_v23, %v1120_v24 }
 0x603   : > { %v1347_v26 = vpop.f32.mrf.mxu0 }
 0x604   : > { %1124 = vst.msk [vmem:[%s268_s17] sm:$0xff] %vm281_vm1, %v1121_v25 }
 0x605   : > { %1536 = shalt.err (!%p1533_p9)
}
 0x606   : > { %s1537_s29 = scalar_lea.hbm %s1858_s10, 128  ;;  %s1541_s28 = scalar_lea.hbm %s1901_s5, 256 }
 0x607   : > { %p1538_p13 = scmp.ne.s32.totalorder %s1858_s10, %s1537_s29  ;;  %p1542_p4 = scmp.lt.s32.totalorder %s1858_s10, %s1901_s5 }
 0x608   : > { %p1543_p8 = scmp.lt.s32.totalorder %s1541_s28, %s1537_s29 }
 0x609   : > { %p1539_p5 = pnand %p1538_p13, %p1917_p0 }
 0x60a   : > { %p1544_p3 = por %p1543_p8, %p1542_p4 }
 0x60b   : > { %p1540_p10 = pneg %p1539_p5 }
 0x60d   : > { %p1545_p11 = pnand %p1544_p3, %p1540_p10 }
 0x60f   : > { %1548 = shalt.err (!%p1545_p11)
}
 0x610   : > { %1358 = dma.vmem_to_hbm [thread:$0]  (%p1917_p0), %s1140_s24, 128, %s1858_s10, %s1126_s11  }
 0x611 PF: > { %s1151_s16 = sand.u32 1, %s1579_s18   ;;  %p1918_p1 = scmp.ne.s32.totalorder %s1907_s25, 0 }
 0x612   : > { %p1919_p2 = scmp.ge.s32.totalorder %s1591_s21, 2  ;;  %s1152_s17 = scalar_lea.sflag [#allocation4], %s1151_s16 }
 0x614   : > { %p1372_p6 = pnand %p1919_p2, %p1918_p1 }
 0x616   : > { %p1373_p12 = pneg %p1372_p6 }
 0x618   : > { %1574 = dma.done.wait (%p1373_p12), %s1152_s17, 128  }
 0x619   : > { %1576 = vsyncadd (%p1373_p12), %s1152_s17, 4294967168  ;;  %p19_p7 = scmp.ge.s32.totalorder %s1711_s15, 4   ;;  %s1920_s18 = smov %s1583_s19 }
 0x61a   : > { %s1921_s19 = smov %s1587_s20  ;;  %s1922_s20 = smov %s1727_s27 }
 0x61b   : > { %s1923_s21 = smov %s1711_s15  ;;  %21 = sbr.rel (!%p19_p7) target bundleno = 6 (0x6), region = 93 }
 0x620   :  { %1157 = vsyncpa [#allocation3], 1 }
 0x621   :  { %1159 = vsyncpa [#allocation3 + $0x1], 1 }
 0x622   :  { %1160 = vsyncpa [#allocation6], 1 }
 0x623   :  { %1161 = vsyncpa [#allocation4], 1 }
 0x624   :  { %1163 = vsyncpa [#allocation4 + $0x1], 1 }

</bundles_post_ra>
